<compile_context>
chip_gen: v7x
topology: tpu7x:2x2x1
jax: 0.10.0
libtpu: 0.0.40
codegen_flags: <defaults>
</compile_context>

<pallas_src>
import functools

import jax
import jax.numpy as jnp
from jax import lax
from jax.experimental import pallas as pl
from jax.experimental.pallas import tpu as pltpu


def _round_up(x, m):
    return ((x + m - 1) // m) * m


def _round_down(x, m):
    return (x // m) * m


def _vmem_capacity_bytes():
    # Physical VMEM per TensorCore; conservative (v7x-sized) fallback if the
    # query is unavailable in this jax version.
    try:
        return int(pltpu.get_tpu_info().vmem_capacity_bytes)
    except Exception:
        return 64 * 1024 * 1024


# ---------------------------------------------------------------------------
# Kernels
# ---------------------------------------------------------------------------
def _gcn_single_block_kernel(x_ref, w_ref, adj_ref, b_ref, o_ref):
    # support = X @ W, then out = adj @ support + bias, all in one VMEM block.
    support = jnp.dot(x_ref[...], w_ref[...], preferred_element_type=jnp.float32)
    out = jnp.dot(
        adj_ref[...], support.astype(adj_ref.dtype),
        preferred_element_type=jnp.float32,
    )
    o_ref[...] = (out + b_ref[...]).astype(o_ref.dtype)


def _support_kernel(x_ref, w_ref, o_ref):
    # One row tile of support = X @ W, stored in the adj compute dtype.
    o_ref[...] = jnp.dot(
        x_ref[...], w_ref[...], preferred_element_type=jnp.float32
    ).astype(o_ref.dtype)


def _gcn_agg_kernel(s_ref, adj_ref, b_ref, o_ref, acc_ref, *,
                    n_valid_k, ct, mask_tail):
    # Grid = (row tiles of adj [parallel], contraction tiles [arbitrary]).
    k = pl.program_id(1)

    @pl.when(k == 0)
    def _():
        acc_ref[...] = jnp.zeros_like(acc_ref)

    adj_t = adj_ref[...]
    sup_t = s_ref[...]
    if mask_tail:
        # Last contraction tile reads past the array bound (no wrapper-side
        # pad of the N^2 adjacency).  Zero-mask the OOB columns of adj and
        # the matching OOB rows of support with a select (not a multiply),
        # so stale NaN/Inf garbage cannot propagate.  For non-last tiles
        # valid >= ct and the select is a no-op; the VPU work hides under
        # the adj HBM stream.
        valid = n_valid_k - k * ct
        col = lax.broadcasted_iota(jnp.int32, adj_t.shape, 1)
        adj_t = jnp.where(col < valid, adj_t, jnp.zeros_like(adj_t))
        row = lax.broadcasted_iota(jnp.int32, sup_t.shape, 0)
        sup_t = jnp.where(row < valid, sup_t, jnp.zeros_like(sup_t))

    acc_ref[...] += jnp.dot(adj_t, sup_t, preferred_element_type=jnp.float32)

    @pl.when(k == pl.num_programs(1) - 1)
    def _():
        o_ref[...] = (acc_ref[...] + b_ref[...]).astype(o_ref.dtype)


# ---------------------------------------------------------------------------
# Wrappers
# ---------------------------------------------------------------------------
def _compute_support(x, weight, out_dtype, budget, support_row_tile=4096):
    # support = X @ W, computed exactly once (row-tiled), stored in the
    # adjacency compute dtype so the aggregation matmul is a homogeneous
    # (fast) MXU pass with no per-step cast.
    N, f_in = x.shape
    f_out = weight.shape[1]
    st = N if support_row_tile >= N else max(8, _round_down(support_row_tile, 8))
    return pl.pallas_call(
        _support_kernel,
        out_shape=jax.ShapeDtypeStruct((N, f_out), out_dtype),
        grid_spec=pltpu.PrefetchScalarGridSpec(
            num_scalar_prefetch=0,
            grid=(pl.cdiv(N, st),),
            in_specs=[
                pl.BlockSpec((st, f_in), lambda i: (i, 0)),
                pl.BlockSpec((f_in, f_out), lambda i: (0, 0)),
            ],
            out_specs=pl.BlockSpec((st, f_out), lambda i: (i, 0)),
        ),
        compiler_params=pltpu.CompilerParams(
            dimension_semantics=("parallel",),
            vmem_limit_bytes=int(budget),
        ),
    )(x, weight)


@functools.partial(
    jax.jit,
    static_argnames=("row_tile", "col_tile", "adj_dtype", "max_single_block_bytes"),
)
def gcn_forward(
    x,
    weight,
    adj,
    bias=None,
    *,
    row_tile=1024,
    col_tile=4096,
    adj_dtype=jnp.bfloat16,
    max_single_block_bytes=None,
):
    N, f_in = x.shape
    f_out = weight.shape[1]
    assert adj.shape == (N, N)

    if bias is None:
        bias = jnp.zeros((f_out,), jnp.float32)
    bias2d = bias.reshape(1, f_out).astype(jnp.float32)

    # adj compute dtype: bf16 by default (HBM-bound kernel -> ~2x).  If the
    # caller already provides adj in the target dtype, no astype pass here.
    if adj_dtype is not None and adj.dtype != jnp.dtype(adj_dtype):
        adj_c = adj.astype(adj_dtype)
    else:
        adj_c = adj

    adj_item = jnp.dtype(adj_c.dtype).itemsize
    x_item = jnp.dtype(x.dtype).itemsize
    w_item = jnp.dtype(weight.dtype).itemsize
    out_item = jnp.dtype(x.dtype).itemsize

    phys_vmem = _vmem_capacity_bytes()
    budget = (phys_vmem * 3) // 4   # ~48 MiB on v7x, ~96 MiB on v5e/v6e

    # ------------------------------------------------------------------
    # Path A: single block (no grid, no scratch) — small / mid graphs.
    # ------------------------------------------------------------------
    single_thr = budget // 2 if max_single_block_bytes is None else max_single_block_bytes
    total_bytes = (
        N * f_in * x_item
        + f_in * f_out * w_item
        + N * N * adj_item
        + N * f_out * (4 + adj_item + out_item)   # support f32 + cast + output
        + 8 * max(128, f_out) * 4                 # bias (padded tile)
    )
    if total_bytes <= single_thr:
        vmem = lambda: pl.BlockSpec(memory_space=pltpu.MemorySpace.VMEM)
        return pl.pallas_call(
            _gcn_single_block_kernel,
            out_shape=jax.ShapeDtypeStruct((N, f_out), x.dtype),
            in_specs=[vmem(), vmem(), vmem(), vmem()],
            out_specs=vmem(),
            compiler_params=pltpu.CompilerParams(vmem_limit_bytes=int(budget)),
        )(x, weight, adj_c, bias2d)

    # ------------------------------------------------------------------
    # Path B: precompute support once, then stream adj (row x K tiles).
    # ------------------------------------------------------------------
    # Tile selection: as big as the VMEM budget allows (amortizes per-step
    # overhead); (8, 128)-aligned or full-dim; no wrapper-side padding.
    rt = N if row_tile >= N else max(8, _round_down(row_tile, 8))
    ct = N if col_tile >= N else max(128, _round_down(col_tile, 128))

    def tiled_est(rt_, ct_):
        return (2 * rt_ * ct_ * adj_item           # adj tiles (double-buffered)
                + 2 * ct_ * f_out * adj_item       # support tiles
                + 2 * rt_ * f_out * out_item       # output tiles
                + rt_ * f_out * 4                  # f32 accumulator
                + 2 * 8 * max(128, f_out) * 4      # bias (padded)
                + (2 << 20))                       # compiler-internal headroom

    while tiled_est(rt, ct) > budget:
        new_ct = max(128, _round_down(ct // 2, 128))
        if new_ct < ct:
            ct = new_ct
            continue
        new_rt = max(8, _round_down(rt // 2, 8))
        if new_rt < rt:
            rt = new_rt
            continue
        break

    # Nudge the row-tile count to be even so the "parallel" row axis splits
    # evenly across both TensorCores on v7x (harmless on single-TC chips).
    n_i = pl.cdiv(N, rt)
    if n_i == 1 and N >= 16:
        rt = _round_up(pl.cdiv(N, 2), 8)
    elif n_i > 1 and n_i % 2 == 1:
        cand = _round_up(pl.cdiv(N, n_i + 1), 8)
        if cand >= 8 and pl.cdiv(N, cand) % 2 == 0:
            rt = cand
    n_i = pl.cdiv(N, rt)
    n_k = pl.cdiv(N, ct)
    mask_tail = (N % ct) != 0

    support = _compute_support(x, weight, adj_c.dtype, budget)

    kernel = functools.partial(
        _gcn_agg_kernel, n_valid_k=N, ct=ct, mask_tail=mask_tail)

    return pl.pallas_call(
        kernel,
        out_shape=jax.ShapeDtypeStruct((N, f_out), x.dtype),
        grid_spec=pltpu.PrefetchScalarGridSpec(
            num_scalar_prefetch=0,
            grid=(n_i, n_k),
            in_specs=[
                pl.BlockSpec((ct, f_out), lambda i, k: (k, 0)),   # support tile
                pl.BlockSpec((rt, ct), lambda i, k: (i, k)),      # adj tile (HBM stream)
                # bias is grid-invariant and ~f_out*4 bytes; double-buffering
                # it is noise, so pipeline_mode=pl.Buffered(1) is skipped.
                pl.BlockSpec((1, f_out), lambda i, k: (0, 0)),
            ],
            out_specs=pl.BlockSpec((rt, f_out), lambda i, k: (i, 0)),
            scratch_shapes=[pltpu.VMEM((rt, f_out), jnp.float32)],
        ),
        compiler_params=pltpu.CompilerParams(
            # Row tiles independent -> parallel (megacore); contraction axis
            # carries the accumulator -> arbitrary (and last, by convention).
            dimension_semantics=("parallel", "arbitrary"),
            vmem_limit_bytes=int(budget),
        ),
    )(support, adj_c, bias2d)


# ---------------------------------------------------------------------------
# Demo / self-test
# ---------------------------------------------------------------------------
def _init_params(key, in_features, out_features):
    # Mirror nn.init.kaiming_uniform_ (a=0 -> gain=sqrt(2)) on weight [in, out]:
    # torch's fan_in for a 2-D tensor is dim 1 => out_features.
    fan_in = out_features
    bound = jnp.sqrt(2.0) * jnp.sqrt(3.0 / fan_in)
    weight = jax.random.uniform(
        key, (in_features, out_features), jnp.float32, minval=-bound, maxval=bound
    )
    bias = jnp.zeros((out_features,), jnp.float32)
    return weight, bias


def _make_adj(key, n):
    # Deterministic sparse-ish adjacency with self loops, row-normalized, dense.
    raw = jax.random.uniform(key, (n, n), jnp.float32)
    mask = (raw < 0.1).astype(jnp.float32)
    adj = mask + jnp.eye(n, dtype=jnp.float32)
    return adj / jnp.sum(adj, axis=1, keepdims=True)


if __name__ == "__main__":
    key = jax.random.PRNGKey(0)
    k_x, k_adj, k_p, k_x2, k_adj2 = jax.random.split(key, 5)

    in_features, out_features = 64, 32
    weight, bias = _init_params(k_p, in_features, out_features)

    # 1) Small graph, exact f32 -> single-block path, tight tolerance.
    N = 128
    x = jax.random.normal(k_x, (N, in_features), jnp.float32)
    adj = _make_adj(k_adj, N)
    ref = adj @ (x @ weight) + bias[None, :]

    out = gcn_forward(x, weight, adj, bias, adj_dtype=jnp.float32)
    jax.block_until_ready(out)
    assert out.shape == (N, out_features)
    assert jnp.allclose(out, ref, atol=1e-4, rtol=1e-4)

    # 2) Same graph, adjacency cast to bf16 once upstream (default fast path;
    #    no wrapper-side astype pass).
    adj_bf16 = adj.astype(jnp.bfloat16)
    out_bf = gcn_forward(x, weight, adj_bf16, bias)
    jax.block_until_ready(out_bf)
    assert jnp.allclose(out_bf, ref, atol=5e-2, rtol=5e-2)

    # 3) Non-divisible N, forced tiled path with auto-chosen tiles (f32).
    N2 = 200
    x2 = jax.random.normal(k_x2, (N2, in_features), jnp.float32)
    adj2 = _make_adj(k_adj2, N2)
    ref2 = adj2 @ (x2 @ weight) + bias[None, :]

    out2 = gcn_forward(
        x2, weight, adj2, bias,
        adj_dtype=jnp.float32, max_single_block_bytes=0,
    )
    jax.block_until_ready(out2)
    assert out2.shape == (N2, out_features)
    assert jnp.allclose(out2, ref2, atol=1e-4, rtol=1e-4)

    # 4) Tiled path with explicit small tiles -> exercises multi-row-tile grid
    #    and in-kernel zero-masking of the non-divisible K tail (no adj pad).
    out3 = gcn_forward(
        x2, weight, adj2, bias,
        adj_dtype=jnp.float32, row_tile=64, col_tile=128,
        max_single_block_bytes=0,
    )
    jax.block_until_ready(out3)
    assert jnp.allclose(out3, ref2, atol=1e-4, rtol=1e-4)

    # 5) bf16 adjacency streaming on the tiled path (f32 accumulate).
    out4 = gcn_forward(
        x2, weight, adj2.astype(jnp.bfloat16), bias,
        row_tile=64, col_tile=128, max_single_block_bytes=0,
    )
    jax.block_until_ready(out4)
    assert jnp.allclose(out4, ref2, atol=5e-2, rtol=5e-2)

    print("KERNEL_OK")
</pallas_src>

<mosaic_0001>
module attributes {stable_mosaic.version = 11 : i64} {
  func.func @_gcn_single_block_kernel(%arg0: memref<128x64xf32, #tpu.memory_space<vmem>>, %arg1: memref<64x32xf32, #tpu.memory_space<vmem>>, %arg2: memref<128x128xf32, #tpu.memory_space<vmem>>, %arg3: memref<1x32xf32, #tpu.memory_space<vmem>>, %arg4: memref<128x32xf32, #tpu.memory_space<vmem>>) attributes {dimension_semantics = [], scalar_prefetch = 0 : i64, scratch_operands = 0 : i64, tpu.core_type = #tpu.core_type<tc>} {
    %c0 = arith.constant 0 : index
    %c0_0 = arith.constant 0 : index
    %0 = vector.load %arg0[%c0, %c0_0] : memref<128x64xf32, #tpu.memory_space<vmem>>, vector<128x64xf32>
    %c0_1 = arith.constant 0 : index
    %c0_2 = arith.constant 0 : index
    %1 = vector.load %arg1[%c0_1, %c0_2] : memref<64x32xf32, #tpu.memory_space<vmem>>, vector<64x32xf32>
    %cst = arith.constant dense<0.000000e+00> : vector<128x32xf32>
    %2 = tpu.matmul %0, %1, %cst {dimension_numbers = #tpu.dot_dimension_numbers<[1], [0], [0], [1], [0, 0, 1, 1], [], []>} : vector<128x64xf32>, vector<64x32xf32>, vector<128x32xf32> -> vector<128x32xf32>
    %c0_3 = arith.constant 0 : index
    %c0_4 = arith.constant 0 : index
    %3 = vector.load %arg2[%c0_3, %c0_4] : memref<128x128xf32, #tpu.memory_space<vmem>>, vector<128x128xf32>
    %cst_5 = arith.constant dense<0.000000e+00> : vector<128x32xf32>
    %4 = tpu.matmul %3, %2, %cst_5 {dimension_numbers = #tpu.dot_dimension_numbers<[1], [0], [0], [1], [0, 0, 1, 1], [], []>} : vector<128x128xf32>, vector<128x32xf32>, vector<128x32xf32> -> vector<128x32xf32>
    %c0_6 = arith.constant 0 : index
    %c0_7 = arith.constant 0 : index
    %5 = vector.load %arg3[%c0_6, %c0_7] : memref<1x32xf32, #tpu.memory_space<vmem>>, vector<1x32xf32>
    %6 = vector.broadcast %5 : vector<1x32xf32> to vector<128x32xf32>
    %7 = arith.addf %4, %6 : vector<128x32xf32>
    %c0_8 = arith.constant 0 : index
    %c0_9 = arith.constant 0 : index
    %8 = vector.load %arg4[%c0_8, %c0_9] : memref<128x32xf32, #tpu.memory_space<vmem>>, vector<128x32xf32>
    tpu.vector_store %arg4[%c0_8, %c0_9], %7 {strides = array<i32>} : memref<128x32xf32, #tpu.memory_space<vmem>>, vector<128x32xf32>,
    return
  }
}

</mosaic_0001>

<bundles_post_ra>
// kernel: gcn_forward.1
= control target key start
LH: loop header
LB: loop body
LE: loop exit
PB: predicated region body
PF: predicated region fallthrough
CT: control target
= control target key end

     0   :  { %vm41_vm0 = vcmask 523264   ;;  %vm403_vm1 = vcmask 261120   ;;  %s885_s1 = inlined_call_operand.vmem [shape: f32[64,32], index: 1, kind: input, shape index: {}]   ;;  %s886_s0 = inlined_call_operand.vmem [shape: f32[128,64], index: 0, kind: input, shape index: {}]   ;;  %s887_s2 = inlined_call_operand.vmem [shape: f32[128,128], index: 2, kind: input, shape index: {}]   ;;  %s888_s3 = inlined_call_operand.vmem [shape: f32[1,32], index: 3, kind: input, shape index: {}]   ;;  %s889_s4 = inlined_call_operand.vmem [shape: f32[128,32], index: 4, kind: output, shape index: {}]  }
   0x1   :  { %v33_v0 = vld [vmem:[%s885_s1] sm:$0xff]  ;;  %v34_v1 = vld [vmem:[%s885_s1 + $0x8] sm:$0xff]  ;;  %v35_v2 = vld [vmem:[%s885_s1 + $0x10] sm:$0xff] }
   0x2   :  { %v593_v3 = vpack.c.bf16 %v34_v1, %v33_v0  ;;  %v36_v4 = vld [vmem:[%s885_s1 + $0x18] sm:$0xff]  ;;  %v37_v6 = vld [vmem:[%s885_s1 + $0x20] sm:$0xff]  ;;  %v38_v7 = vld [vmem:[%s885_s1 + $0x28] sm:$0xff] }
   0x3   :  { %v597_v5 = vpack.c.bf16 %v36_v4, %v35_v2  ;;  %v17_v8 = vld [vmem:[%s886_s0] sm:$0xff]  ;;  %v601_v9 = vpack.c.bf16 %v38_v7, %v37_v6  ;;  %v39_v10 = vld [vmem:[%s885_s1 + $0x30] sm:$0xff]  ;;  %v40_v11 = vld [vmem:[%s885_s1 + $0x38] sm:$0xff] }
   0x4   :  { %594 = vmatprep.subr.bf16.mxu0 %v593_v3  ;;  %513 = vmatprep.mubr.msk.f32.mxu0 %vm41_vm0, %v17_v8  ;;  %v605_v12 = vpack.c.bf16 %v40_v11, %v39_v10  ;;  %v18_v13 = vld [vmem:[%s886_s0 + $0x8] sm:$0xff]  ;;  %v19_v14 = vld [vmem:[%s886_s0 + $0x10] sm:$0xff]  ;;  %v20_v15 = vld [vmem:[%s886_s0 + $0x18] sm:$0xff] }
   0x5   :  { %596 = vmatpush3.bf16.msra.mxu0 %v593_v3  ;;  %v21_v16 = vld [vmem:[%s886_s0 + $0x20] sm:$0xff]  ;;  %v22_v17 = vld [vmem:[%s886_s0 + $0x28] sm:$0xff]  ;;  %v23_v18 = vld [vmem:[%s886_s0 + $0x30] sm:$0xff] }
   0x6   :  { %598 = vmatprep.subr.bf16.mxu0 %v597_v5  ;;  %v24_v19 = vld [vmem:[%s886_s0 + $0x38] sm:$0xff]  ;;  %v25_v20 = vld [vmem:[%s886_s0 + $0x40] sm:$0xff]  ;;  %v26_v21 = vld [vmem:[%s886_s0 + $0x48] sm:$0xff] }
   0x7   :  { %v27_v22 = vld [vmem:[%s886_s0 + $0x50] sm:$0xff]  ;;  %v28_v23 = vld [vmem:[%s886_s0 + $0x58] sm:$0xff]  ;;  %v29_v24 = vld [vmem:[%s886_s0 + $0x60] sm:$0xff] }
   0x8   :  { %v30_v25 = vld [vmem:[%s886_s0 + $0x68] sm:$0xff]  ;;  %v31_v26 = vld [vmem:[%s886_s0 + $0x70] sm:$0xff]  ;;  %v32_v27 = vld [vmem:[%s886_s0 + $0x78] sm:$0xff] }
   0x9   :  { %600 = vmatpush3.bf16.msra.mxu0 %v597_v5  ;;  %v239_v28 = vld [vmem:[%s887_s2 + $0x20] sm:$0xff]  ;;  %v240_v54 = vld [vmem:[%s887_s2 + $0x28] sm:$0xff]  ;;  %v241_v56 = vld [vmem:[%s887_s2 + $0x30] sm:$0xff] }
   0xa   :  { %602 = vmatprep.subr.bf16.mxu0 %v601_v9  ;;  %575 = vmatprep.mubr.f32.mxu1 %v239_v28  ;;  %v235_v29 = vld [vmem:[%s887_s2] sm:$0xff]  ;;  %v236_v55 = vld [vmem:[%s887_s2 + $0x8] sm:$0xff]  ;;  %v237_v57 = vld [vmem:[%s887_s2 + $0x10] sm:$0xff] }
   0xb   :  { %v242_v58 = vld [vmem:[%s887_s2 + $0x38] sm:$0xff]  ;;  %v243_v60 = vld [vmem:[%s887_s2 + $0x40] sm:$0xff]  ;;  %v244_v61 = vld [vmem:[%s887_s2 + $0x48] sm:$0xff] }
   0xc   :  { %v238_v59 = vld [vmem:[%s887_s2 + $0x18] sm:$0xff]  ;;  %v245_v62 = vld [vmem:[%s887_s2 + $0x50] sm:$0xff]  ;;  %v247_v0 = vld [vmem:[%s887_s2 + $0x60] sm:$0xff] }
   0xd   :  { %604 = vmatpush3.bf16.msra.mxu0 %v601_v9  ;;  %v246_v63 = vld [vmem:[%s887_s2 + $0x58] sm:$0xff]  ;;  %v248_v1 = vld [vmem:[%s887_s2 + $0x68] sm:$0xff]  ;;  %v249_v2 = vld [vmem:[%s887_s2 + $0x70] sm:$0xff] }
   0xe   :  { %606 = vmatprep.subr.bf16.mxu0 %v605_v12  ;;  %v250_v3 = vld [vmem:[%s887_s2 + $0x78] sm:$0xff]  ;;  %v440_v4 = vld [vmem:[%s888_s3] ss:$0 sm:$0xff] }
  0x11   :  { %608 = vmatpush3.bf16.msra.mxu0 %v605_v12 }
  0x14   :  { %514 = vmatmul.mubr.msk.f32.vlgmr.msra.gmra.mrb[0].mxu0 %vm41_vm0, %v18_v13 }
  0x15   :  { %516 = vmatprep.mubr.msk.f32.mxu0 %vm41_vm0, %v19_v14 }
  0x18   :  { %517 = vmatmul.mubr.msk.f32.gmra.mrb[2].mxu0 %vm41_vm0, %v20_v15 }
  0x19   :  { %519 = vmatprep.mubr.msk.f32.mxu0 %vm41_vm0, %v21_v16 }
  0x1c   :  { %520 = vmatmul.mubr.msk.f32.gmra.mrb[4].mxu0 %vm41_vm0, %v22_v17 }
  0x1d   :  { %522 = vmatprep.mubr.msk.f32.mxu0 %vm41_vm0, %v23_v18 }
  0x20   :  { %523 = vmatmul.mubr.msk.f32.gmra.mrb[6].mxu0 %vm41_vm0, %v24_v19 }
  0x21   :  { %525 = vmatprep.mubr.msk.f32.mxu0 %vm41_vm0, %v25_v20 }
  0x24   :  { %526 = vmatmul.mubr.msk.f32.gmra.mrb[8].mxu0 %vm41_vm0, %v26_v21 }
  0x25   :  { %528 = vmatprep.mubr.msk.f32.mxu0 %vm41_vm0, %v27_v22 }
  0x28   :  { %529 = vmatmul.mubr.msk.f32.gmra.mrb[10].mxu0 %vm41_vm0, %v28_v23 }
  0x29   :  { %531 = vmatprep.mubr.msk.f32.mxu0 %vm41_vm0, %v29_v24 }
  0x2c   :  { %532 = vmatmul.mubr.msk.f32.gmra.mrb[12].mxu0 %vm41_vm0, %v30_v25 }
  0x2d   :  { %534 = vmatprep.mubr.msk.f32.mxu0 %vm41_vm0, %v31_v26 }
  0x30   :  { %535 = vmatmul.mubr.msk.f32.gmra.mrb[14].mxu0 %vm41_vm0, %v32_v27 }
  0x31   :  { %569 = vmatprep.mubr.f32.mxu0 %v235_v29 }
  0xe7   :  { %v515_v30 = vpop.f32.mrb[0].mxu0 }
  0xe8   :  { %v156_v31 = vpop.f32.mrb[1].mxu0 }
  0xe9   :  { %v609_v32 = vpack.c.bf16 %v515_v30, %v156_v31 }
  0xeb   :  { %v518_v33 = vpop.f32.mrb[2].mxu0  ;;  %610 = vmatprep.subr.bf16.mxu0 %v609_v32  ;;  %641 = vmatprep.subr.bf16.mxu1 %v609_v32 }
  0xec   :  { %v166_v34 = vpop.f32.mrb[3].mxu0  ;;  %612 = vmatpush3.bf16.msra.mxu0 %v609_v32  ;;  %649 = vmatpush3.bf16.msra.mxu1 %v609_v32 }
  0xed   :  { %v613_v35 = vpack.c.bf16 %v518_v33, %v166_v34 }
  0xef   :  { %v521_v36 = vpop.f32.mrb[4].mxu0  ;;  %614 = vmatprep.subr.bf16.mxu0 %v613_v35  ;;  %642 = vmatprep.subr.bf16.mxu1 %v613_v35 }
  0xf0   :  { %v176_v37 = vpop.f32.mrb[5].mxu0  ;;  %616 = vmatpush3.bf16.msra.mxu0 %v613_v35  ;;  %650 = vmatpush3.bf16.msra.mxu1 %v613_v35 }
  0xf1   :  { %v617_v38 = vpack.c.bf16 %v521_v36, %v176_v37 }
  0xf3   :  { %v524_v39 = vpop.f32.mrb[6].mxu0  ;;  %618 = vmatprep.subr.bf16.mxu0 %v617_v38  ;;  %643 = vmatprep.subr.bf16.mxu1 %v617_v38 }
  0xf4   :  { %v186_v40 = vpop.f32.mrb[7].mxu0  ;;  %620 = vmatpush3.bf16.msra.mxu0 %v617_v38  ;;  %651 = vmatpush3.bf16.msra.mxu1 %v617_v38 }
  0xf5   :  { %v621_v41 = vpack.c.bf16 %v524_v39, %v186_v40 }
  0xf7   :  { %v527_v42 = vpop.f32.mrb[8].mxu0  ;;  %622 = vmatprep.subr.bf16.mxu0 %v621_v41  ;;  %644 = vmatprep.subr.bf16.mxu1 %v621_v41 }
  0xf8   :  { %v196_v43 = vpop.f32.mrb[9].mxu0  ;;  %624 = vmatpush3.bf16.msra.mxu0 %v621_v41  ;;  %652 = vmatpush3.bf16.msra.mxu1 %v621_v41 }
  0xf9   :  { %v625_v44 = vpack.c.bf16 %v527_v42, %v196_v43 }
  0xfb   :  { %v530_v45 = vpop.f32.mrb[10].mxu0  ;;  %626 = vmatprep.subr.bf16.mxu0 %v625_v44  ;;  %645 = vmatprep.subr.bf16.mxu1 %v625_v44 }
  0xfc   :  { %v206_v46 = vpop.f32.mrb[11].mxu0  ;;  %628 = vmatpush3.bf16.msra.mxu0 %v625_v44  ;;  %653 = vmatpush3.bf16.msra.mxu1 %v625_v44 }
  0xfd   :  { %v629_v47 = vpack.c.bf16 %v530_v45, %v206_v46 }
  0xff   :  { %v533_v48 = vpop.f32.mrb[12].mxu0  ;;  %630 = vmatprep.subr.bf16.mxu0 %v629_v47  ;;  %646 = vmatprep.subr.bf16.mxu1 %v629_v47 }
 0x100   :  { %v216_v49 = vpop.f32.mrb[13].mxu0  ;;  %632 = vmatpush3.bf16.msra.mxu0 %v629_v47  ;;  %654 = vmatpush3.bf16.msra.mxu1 %v629_v47 }
 0x101   :  { %v633_v50 = vpack.c.bf16 %v533_v48, %v216_v49 }
 0x103   :  { %v536_v51 = vpop.f32.mrb[14].mxu0  ;;  %634 = vmatprep.subr.bf16.mxu0 %v633_v50  ;;  %647 = vmatprep.subr.bf16.mxu1 %v633_v50 }
 0x104   :  { %v226_v52 = vpop.f32.mrb[15].mxu0  ;;  %636 = vmatpush3.bf16.msra.mxu0 %v633_v50  ;;  %655 = vmatpush3.bf16.msra.mxu1 %v633_v50 }
 0x105   :  { %v637_v53 = vpack.c.bf16 %v536_v51, %v226_v52 }
 0x107   :  { %638 = vmatprep.subr.bf16.mxu0 %v637_v53  ;;  %648 = vmatprep.subr.bf16.mxu1 %v637_v53 }
 0x108   :  { %640 = vmatpush3.bf16.msra.mxu0 %v637_v53  ;;  %656 = vmatpush3.bf16.msra.mxu1 %v637_v53 }
 0x10b   :  { %576 = vmatmul.mubr.f32.vlgmr.msra.gmra.mrb[0].mxu1 %v240_v54  ;;  %570 = vmatmul.mubr.f32.vlgmr.msra.gmra.mrb[16].mxu0 %v236_v55 }
 0x10c   :  { %578 = vmatprep.mubr.f32.mxu1 %v241_v56  ;;  %572 = vmatprep.mubr.f32.mxu0 %v237_v57 }
 0x10f   :  { %579 = vmatmul.mubr.f32.gmra.mrb[2].mxu1 %v242_v58  ;;  %573 = vmatmul.mubr.f32.gmra.mrb[18].mxu0 %v238_v59 }
 0x110   :  { %581 = vmatprep.mubr.f32.mxu1 %v243_v60 }
 0x113   :  { %582 = vmatmul.mubr.f32.gmra.mrb[4].mxu1 %v244_v61 }
 0x114   :  { %584 = vmatprep.mubr.f32.mxu1 %v245_v62 }
 0x117   :  { %585 = vmatmul.mubr.f32.gmra.mrb[6].mxu1 %v246_v63 }
 0x118   :  { %587 = vmatprep.mubr.f32.mxu1 %v247_v0 }
 0x11b   :  { %588 = vmatmul.mubr.f32.gmra.mrb[8].mxu1 %v248_v1 }
 0x11c   :  { %590 = vmatprep.mubr.f32.mxu1 %v249_v2 }
 0x11f   :  { %591 = vmatmul.mubr.f32.gmra.mrb[10].mxu1 %v250_v3 }
 0x1de   :  { %v577_v5 = vpop.f32.mrb[0].mxu1  ;;  %v571_v6 = vpop.f32.mrb[16].mxu0 }
 0x1df   :  { %v350_v7 = vadd.f32 %v577_v5, %v440_v4  ;;  %v344_v8 = vpop.f32.mrb[1].mxu1  ;;  %v330_v9 = vadd.f32 %v571_v6, %v440_v4  ;;  %v324_v10 = vpop.f32.mrb[17].mxu0 }
 0x1e0   :  { %v345_v11 = vadd.f32 %v440_v4, %v344_v8  ;;  %v325_v12 = vadd.f32 %v440_v4, %v324_v10 }
 0x1e1   :  { %409 = vst.msk [vmem:[%s889_s4 + $0x28] sm:$0xff] %vm403_vm1, %v350_v7  ;;  %405 = vst.msk [vmem:[%s889_s4 + $0x8] sm:$0xff] %vm403_vm1, %v330_v9 }
 0x1e2   :  { %408 = vst.msk [vmem:[%s889_s4 + $0x20] sm:$0xff] %vm403_vm1, %v345_v11  ;;  %v580_v13 = vpop.f32.mrb[2].mxu1  ;;  %404 = vst.msk [vmem:[%s889_s4] sm:$0xff] %vm403_vm1, %v325_v12  ;;  %v574_v14 = vpop.f32.mrb[18].mxu0 }
 0x1e3   :  { %v360_v15 = vadd.f32 %v580_v13, %v440_v4  ;;  %v354_v16 = vpop.f32.mrb[3].mxu1  ;;  %v340_v17 = vadd.f32 %v574_v14, %v440_v4  ;;  %v334_v18 = vpop.f32.mrb[19].mxu0 }
 0x1e4   :  { %v355_v19 = vadd.f32 %v440_v4, %v354_v16  ;;  %v335_v20 = vadd.f32 %v440_v4, %v334_v18 }
 0x1e5   :  { %411 = vst.msk [vmem:[%s889_s4 + $0x38] sm:$0xff] %vm403_vm1, %v360_v15  ;;  %407 = vst.msk [vmem:[%s889_s4 + $0x18] sm:$0xff] %vm403_vm1, %v340_v17 }
 0x1e6   :  { %410 = vst.msk [vmem:[%s889_s4 + $0x30] sm:$0xff] %vm403_vm1, %v355_v19  ;;  %v583_v21 = vpop.f32.mrb[4].mxu1  ;;  %406 = vst.msk [vmem:[%s889_s4 + $0x10] sm:$0xff] %vm403_vm1, %v335_v20 }
 0x1e7   :  { %v370_v22 = vadd.f32 %v583_v21, %v440_v4  ;;  %v364_v23 = vpop.f32.mrb[5].mxu1 }
 0x1e8   :  { %v365_v24 = vadd.f32 %v440_v4, %v364_v23 }
 0x1e9   :  { %413 = vst.msk [vmem:[%s889_s4 + $0x48] sm:$0xff] %vm403_vm1, %v370_v22 }
 0x1ea   :  { %412 = vst.msk [vmem:[%s889_s4 + $0x40] sm:$0xff] %vm403_vm1, %v365_v24  ;;  %v586_v25 = vpop.f32.mrb[6].mxu1 }
 0x1eb   :  { %v380_v26 = vadd.f32 %v586_v25, %v440_v4  ;;  %v374_v27 = vpop.f32.mrb[7].mxu1 }
 0x1ec   :  { %v375_v28 = vadd.f32 %v440_v4, %v374_v27 }
 0x1ed   :  { %415 = vst.msk [vmem:[%s889_s4 + $0x58] sm:$0xff] %vm403_vm1, %v380_v26 }
 0x1ee   :  { %414 = vst.msk [vmem:[%s889_s4 + $0x50] sm:$0xff] %vm403_vm1, %v375_v28  ;;  %v589_v29 = vpop.f32.mrb[8].mxu1 }
 0x1ef   :  { %v390_v30 = vadd.f32 %v589_v29, %v440_v4  ;;  %v384_v31 = vpop.f32.mrb[9].mxu1 }
 0x1f0   :  { %v385_v32 = vadd.f32 %v440_v4, %v384_v31 }
 0x1f1   :  { %417 = vst.msk [vmem:[%s889_s4 + $0x68] sm:$0xff] %vm403_vm1, %v390_v30 }
 0x1f2   :  { %416 = vst.msk [vmem:[%s889_s4 + $0x60] sm:$0xff] %vm403_vm1, %v385_v32  ;;  %v592_v33 = vpop.f32.mrb[10].mxu1 }
 0x1f3   :  { %v400_v34 = vadd.f32 %v592_v33, %v440_v4  ;;  %v394_v35 = vpop.f32.mrb[11].mxu1 }
 0x1f4   :  { %v395_v36 = vadd.f32 %v440_v4, %v394_v35 }
 0x1f5   :  { %419 = vst.msk [vmem:[%s889_s4 + $0x78] sm:$0xff] %vm403_vm1, %v400_v34 }
 0x1f6   :  { %418 = vst.msk [vmem:[%s889_s4 + $0x70] sm:$0xff] %vm403_vm1, %v395_v36 }

</bundles_post_ra>
